<compile_context>
chip_gen: v7x
topology: tpu7x:2x2x1
jax: 0.10.0
libtpu: 0.0.40
codegen_flags: <defaults>
</compile_context>

<pallas_src>
import functools

import jax
import jax.numpy as jnp
from jax import lax
from jax.experimental import pallas as pl
from jax.experimental.pallas import tpu as pltpu

C_IN = 1
C_OUT = 3
KH = KW = 3
_SUBROWS = 8  # rows per in-kernel chunk: bounds vreg live ranges (no spills)


def conv2d_flat_kernel(x_ref, w_ref, b_ref, o_ref, *, width):
    # x_ref : (B, L)            VMEM, flattened (H*W) images, C_in == 1
    # w_ref : (C_OUT*KH*KW,)    SMEM, flattened conv weights (OIHW, row-major)
    # b_ref : (C_OUT,)          SMEM
    # o_ref : (B, C_OUT, LOUT)  VMEM, LOUT = H*W (lane-dense; wrapper crops)
    #
    # In flattened coordinates, tap (ki, kj) of the 3x3 kernel is a pure lane
    # shift by d = ki*width + kj, so the valid conv is 9 shifted FMAs on
    # lane-dense slabs.  Row-boundary / tail garbage only lands at output
    # positions with col >= OW or row >= OH, which the wrapper crops away.
    B, L = x_ref.shape
    _, _, lout = o_ref.shape
    d_max = (KH - 1) * width + (KW - 1)
    pad = max(0, d_max + lout - L)          # in-vreg zero extension
    assert d_max + lout <= L + pad          # every tap slice stays in bounds

    def do_rows(row0, nrows):
        x = x_ref[pl.ds(row0, nrows), :]                            # (nrows, L)
        if pad:
            # Zero-extend along lanes inside the kernel (concat boundary is
            # 128-aligned at W=16); avoids any wrapper-side input pad.
            x = jnp.concatenate(
                [x, jnp.zeros((nrows, pad), x.dtype)], axis=-1)     # (nrows, L+pad)

        # Bias-initialized accumulators, one per output channel.
        accs = [jnp.full((nrows, lout), b_ref[co], dtype=jnp.float32)
                for co in range(C_OUT)]

        # Outer loop over the 9 taps: each lane shift materialized once.
        # Inner loop over channels: 3 FMAs reusing the shifted slab.
        for ki in range(KH):
            for kj in range(KW):
                d = ki * width + kj
                shifted = x[:, d:d + lout]                          # static lane shift
                for co in range(C_OUT):
                    w = w_ref[co * (KH * KW) + ki * KW + kj]        # SMEM scalar
                    accs[co] = accs[co] + w * shifted

        # Channels stacked on axis=1 -> already in (N, C, H*W) order: one
        # coalesced store per chunk, no wrapper transpose needed.
        o_ref[pl.ds(row0, nrows), :, :] = (
            jnp.stack(accs, axis=1).astype(o_ref.dtype))

    n_full = B // _SUBROWS
    rem = B - n_full * _SUBROWS
    if n_full == 1 and rem == 0:
        do_rows(0, B)                           # single chunk: straight-line
    elif n_full > 0:
        def body(i, carry):
            do_rows(pl.multiple_of(i * _SUBROWS, _SUBROWS), _SUBROWS)
            return carry
        lax.fori_loop(0, n_full, body, 0, unroll=False)
    if rem:
        do_rows(n_full * _SUBROWS, rem)         # static tail chunk (e.g. B=2)


def conv2d_pallas(x, weight, bias, *, b_tile=None):
    """x: (N, 1, H, W) f32; weight: (3, 1, 3, 3) f32; bias: (3,) f32."""
    N, cin, H, W = x.shape
    assert cin == C_IN
    OH, OW = H - KH + 1, W - KW + 1
    L = H * W
    # Lane-dense output: full H*W lane extent (a multiple of 128 at W=16), so
    # stores are unmasked; rows >= OH / cols >= OW are cropped by the slice
    # below.
    LOUT = H * W

    x_flat = x.reshape(N, L)        # (N, H*W): 256-lane rows here
    w_flat = weight.reshape(-1)     # (C_OUT*KH*KW,)

    if b_tile is None:
        # ~2 MiB per grid step: near the HBM roofline once N is large, while
        # double-buffered in+out blocks stay well under the default scoped
        # VMEM limit on every generation (incl. v7x's smaller 64 MiB VMEM).
        bytes_per_row = 4 * (L + C_OUT * LOUT)
        rows = max(_SUBROWS,
                   ((2 << 20) // bytes_per_row) // _SUBROWS * _SUBROWS)
        b_tile = min(N, rows)       # either full batch or a multiple of 8
    grid = (pl.cdiv(N, b_tile),)
    # NOTE: if N % b_tile != 0, the tail rows of the last block compute on
    # garbage input; those rows lie past the output array edge and are
    # discarded by Pallas, so this is benign.

    kernel = functools.partial(conv2d_flat_kernel, width=W)

    out_flat = pl.pallas_call(
        kernel,
        out_shape=jax.ShapeDtypeStruct((N, C_OUT, LOUT), x.dtype),
        grid=grid,
        in_specs=[
            pl.BlockSpec((b_tile, L), lambda n: (n, 0)),
            # Conv weights / bias are 27 + 3 scalars: keep them in SMEM,
            # shared across all grid steps.
            pl.BlockSpec(memory_space=pltpu.MemorySpace.SMEM),
            pl.BlockSpec(memory_space=pltpu.MemorySpace.SMEM),
        ],
        out_specs=pl.BlockSpec((b_tile, C_OUT, LOUT), lambda n: (n, 0, 0)),
        compiler_params=pltpu.CompilerParams(
            # Batch steps are independent.  (True 2-TC sharding on v7x would
            # need CORE_PARALLEL / pl.core_map and only pays off at large N.)
            dimension_semantics=("parallel",),
        ),
    )(x_flat, w_flat, bias)

    # (N, C_OUT, H*W) -> (N, C_OUT, H, W) is a contiguous (bitcast) reshape;
    # a single slice crops the invalid tail rows/cols of the "valid" conv.
    return out_flat.reshape(N, C_OUT, H, W)[:, :, :OH, :OW]


if __name__ == "__main__":
    key = jax.random.PRNGKey(0)
    k_x, k_w, k_b = jax.random.split(key, 3)

    # Small shapes consistent with Conv2d(1, 3, 3): N=2, C_in=1, H=W=16.
    N, H, W = 2, 16, 16
    x = jax.random.normal(k_x, (N, C_IN, H, W), dtype=jnp.float32)

    # Deterministic synthetic parameters (PyTorch default-init-like scale).
    fan_in = C_IN * KH * KW
    bound = 1.0 / (fan_in ** 0.5)
    weight = jax.random.uniform(k_w, (C_OUT, C_IN, KH, KW),
                                minval=-bound, maxval=bound, dtype=jnp.float32)
    bias = jax.random.uniform(k_b, (C_OUT,),
                              minval=-bound, maxval=bound, dtype=jnp.float32)

    out = conv2d_pallas(x, weight, bias)
    out = jax.block_until_ready(out)

    # Pure-JAX reference check (valid conv, NCHW).
    ref = lax.conv_general_dilated(
        x, weight, window_strides=(1, 1), padding="VALID",
        dimension_numbers=("NCHW", "OIHW", "NCHW"),
        precision=lax.Precision.HIGHEST,
    ) + bias.reshape(1, C_OUT, 1, 1)
    assert out.shape == (N, C_OUT, H - 2, W - 2)
    assert jnp.allclose(out, ref, atol=1e-5, rtol=1e-5)

    print("KERNEL_OK")
</pallas_src>

<mosaic_0001>
module attributes {stable_mosaic.version = 11 : i64} {
  func.func @conv2d_flat_kernel(%arg0: i32, %arg1: memref<2x256xf32, #tpu.memory_space<vmem>>, %arg2: memref<27xf32, #tpu.memory_space<smem>>, %arg3: memref<3xf32, #tpu.memory_space<smem>>, %arg4: memref<2x3x256xf32, #tpu.memory_space<vmem>>) attributes {dimension_semantics = [#tpu.dimension_semantics<parallel>], iteration_bounds = array<i64: 1>, scalar_prefetch = 0 : i64, scratch_operands = 0 : i64, tpu.core_type = #tpu.core_type<tc>, window_params = [{transform_indices = @transform_0, window_bounds = array<i64: 2, 256>}, {transform_indices = @transform_1, window_bounds = array<i64: 27>}, {transform_indices = @transform_2, window_bounds = array<i64: 3>}, {transform_indices = @transform_3, window_bounds = array<i64: 2, 3, 256>}]} {
    %c0 = arith.constant 0 : index
    %c0_0 = arith.constant 0 : index
    %0 = vector.load %arg1[%c0, %c0_0] : memref<2x256xf32, #tpu.memory_space<vmem>>, vector<2x256xf32>
    %cst = arith.constant 0.000000e+00 : f32
    %1 = vector.broadcast %cst : f32 to vector<2x34xf32>
    %2 = tpu.concatenate %0, %1 in 1 : vector<2x256xf32>, vector<2x34xf32> -> vector<2x290xf32>
    %c0_1 = arith.constant 0 : index
    %3 = memref.load %arg3[%c0_1] : memref<3xf32, #tpu.memory_space<smem>>
    %4 = vector.broadcast %3 : f32 to vector<2x256xf32>
    %c1 = arith.constant 1 : index
    %5 = memref.load %arg3[%c1] : memref<3xf32, #tpu.memory_space<smem>>
    %6 = vector.broadcast %5 : f32 to vector<2x256xf32>
    %c2 = arith.constant 2 : index
    %7 = memref.load %arg3[%c2] : memref<3xf32, #tpu.memory_space<smem>>
    %8 = vector.broadcast %7 : f32 to vector<2x256xf32>
    %9 = vector.extract_strided_slice %2 {offsets = [0, 0], sizes = [2, 256], strides = [1, 1]} : vector<2x290xf32> to vector<2x256xf32>
    %c0_2 = arith.constant 0 : index
    %10 = memref.load %arg2[%c0_2] : memref<27xf32, #tpu.memory_space<smem>>
    %11 = vector.broadcast %10 : f32 to vector<2x256xf32>
    %12 = arith.mulf %11, %9 : vector<2x256xf32>
    %13 = arith.addf %4, %12 : vector<2x256xf32>
    %c9 = arith.constant 9 : index
    %14 = memref.load %arg2[%c9] : memref<27xf32, #tpu.memory_space<smem>>
    %15 = vector.broadcast %14 : f32 to vector<2x256xf32>
    %16 = arith.mulf %15, %9 : vector<2x256xf32>
    %17 = arith.addf %6, %16 : vector<2x256xf32>
    %c18 = arith.constant 18 : index
    %18 = memref.load %arg2[%c18] : memref<27xf32, #tpu.memory_space<smem>>
    %19 = vector.broadcast %18 : f32 to vector<2x256xf32>
    %20 = arith.mulf %19, %9 : vector<2x256xf32>
    %21 = arith.addf %8, %20 : vector<2x256xf32>
    %22 = vector.extract_strided_slice %2 {offsets = [0, 1], sizes = [2, 256], strides = [1, 1]} : vector<2x290xf32> to vector<2x256xf32>
    %c1_3 = arith.constant 1 : index
    %23 = memref.load %arg2[%c1_3] : memref<27xf32, #tpu.memory_space<smem>>
    %24 = vector.broadcast %23 : f32 to vector<2x256xf32>
    %25 = arith.mulf %24, %22 : vector<2x256xf32>
    %26 = arith.addf %13, %25 : vector<2x256xf32>
    %c10 = arith.constant 10 : index
    %27 = memref.load %arg2[%c10] : memref<27xf32, #tpu.memory_space<smem>>
    %28 = vector.broadcast %27 : f32 to vector<2x256xf32>
    %29 = arith.mulf %28, %22 : vector<2x256xf32>
    %30 = arith.addf %17, %29 : vector<2x256xf32>
    %c19 = arith.constant 19 : index
    %31 = memref.load %arg2[%c19] : memref<27xf32, #tpu.memory_space<smem>>
    %32 = vector.broadcast %31 : f32 to vector<2x256xf32>
    %33 = arith.mulf %32, %22 : vector<2x256xf32>
    %34 = arith.addf %21, %33 : vector<2x256xf32>
    %35 = vector.extract_strided_slice %2 {offsets = [0, 2], sizes = [2, 256], strides = [1, 1]} : vector<2x290xf32> to vector<2x256xf32>
    %c2_4 = arith.constant 2 : index
    %36 = memref.load %arg2[%c2_4] : memref<27xf32, #tpu.memory_space<smem>>
    %37 = vector.broadcast %36 : f32 to vector<2x256xf32>
    %38 = arith.mulf %37, %35 : vector<2x256xf32>
    %39 = arith.addf %26, %38 : vector<2x256xf32>
    %c11 = arith.constant 11 : index
    %40 = memref.load %arg2[%c11] : memref<27xf32, #tpu.memory_space<smem>>
    %41 = vector.broadcast %40 : f32 to vector<2x256xf32>
    %42 = arith.mulf %41, %35 : vector<2x256xf32>
    %43 = arith.addf %30, %42 : vector<2x256xf32>
    %c20 = arith.constant 20 : index
    %44 = memref.load %arg2[%c20] : memref<27xf32, #tpu.memory_space<smem>>
    %45 = vector.broadcast %44 : f32 to vector<2x256xf32>
    %46 = arith.mulf %45, %35 : vector<2x256xf32>
    %47 = arith.addf %34, %46 : vector<2x256xf32>
    %48 = vector.extract_strided_slice %2 {offsets = [0, 16], sizes = [2, 256], strides = [1, 1]} : vector<2x290xf32> to vector<2x256xf32>
    %c3 = arith.constant 3 : index
    %49 = memref.load %arg2[%c3] : memref<27xf32, #tpu.memory_space<smem>>
    %50 = vector.broadcast %49 : f32 to vector<2x256xf32>
    %51 = arith.mulf %50, %48 : vector<2x256xf32>
    %52 = arith.addf %39, %51 : vector<2x256xf32>
    %c12 = arith.constant 12 : index
    %53 = memref.load %arg2[%c12] : memref<27xf32, #tpu.memory_space<smem>>
    %54 = vector.broadcast %53 : f32 to vector<2x256xf32>
    %55 = arith.mulf %54, %48 : vector<2x256xf32>
    %56 = arith.addf %43, %55 : vector<2x256xf32>
    %c21 = arith.constant 21 : index
    %57 = memref.load %arg2[%c21] : memref<27xf32, #tpu.memory_space<smem>>
    %58 = vector.broadcast %57 : f32 to vector<2x256xf32>
    %59 = arith.mulf %58, %48 : vector<2x256xf32>
    %60 = arith.addf %47, %59 : vector<2x256xf32>
    %61 = vector.extract_strided_slice %2 {offsets = [0, 17], sizes = [2, 256], strides = [1, 1]} : vector<2x290xf32> to vector<2x256xf32>
    %c4 = arith.constant 4 : index
    %62 = memref.load %arg2[%c4] : memref<27xf32, #tpu.memory_space<smem>>
    %63 = vector.broadcast %62 : f32 to vector<2x256xf32>
    %64 = arith.mulf %63, %61 : vector<2x256xf32>
    %65 = arith.addf %52, %64 : vector<2x256xf32>
    %c13 = arith.constant 13 : index
    %66 = memref.load %arg2[%c13] : memref<27xf32, #tpu.memory_space<smem>>
    %67 = vector.broadcast %66 : f32 to vector<2x256xf32>
    %68 = arith.mulf %67, %61 : vector<2x256xf32>
    %69 = arith.addf %56, %68 : vector<2x256xf32>
    %c22 = arith.constant 22 : index
    %70 = memref.load %arg2[%c22] : memref<27xf32, #tpu.memory_space<smem>>
    %71 = vector.broadcast %70 : f32 to vector<2x256xf32>
    %72 = arith.mulf %71, %61 : vector<2x256xf32>
    %73 = arith.addf %60, %72 : vector<2x256xf32>
    %74 = vector.extract_strided_slice %2 {offsets = [0, 18], sizes = [2, 256], strides = [1, 1]} : vector<2x290xf32> to vector<2x256xf32>
    %c5 = arith.constant 5 : index
    %75 = memref.load %arg2[%c5] : memref<27xf32, #tpu.memory_space<smem>>
    %76 = vector.broadcast %75 : f32 to vector<2x256xf32>
    %77 = arith.mulf %76, %74 : vector<2x256xf32>
    %78 = arith.addf %65, %77 : vector<2x256xf32>
    %c14 = arith.constant 14 : index
    %79 = memref.load %arg2[%c14] : memref<27xf32, #tpu.memory_space<smem>>
    %80 = vector.broadcast %79 : f32 to vector<2x256xf32>
    %81 = arith.mulf %80, %74 : vector<2x256xf32>
    %82 = arith.addf %69, %81 : vector<2x256xf32>
    %c23 = arith.constant 23 : index
    %83 = memref.load %arg2[%c23] : memref<27xf32, #tpu.memory_space<smem>>
    %84 = vector.broadcast %83 : f32 to vector<2x256xf32>
    %85 = arith.mulf %84, %74 : vector<2x256xf32>
    %86 = arith.addf %73, %85 : vector<2x256xf32>
    %87 = vector.extract_strided_slice %2 {offsets = [0, 32], sizes = [2, 256], strides = [1, 1]} : vector<2x290xf32> to vector<2x256xf32>
    %c6 = arith.constant 6 : index
    %88 = memref.load %arg2[%c6] : memref<27xf32, #tpu.memory_space<smem>>
    %89 = vector.broadcast %88 : f32 to vector<2x256xf32>
    %90 = arith.mulf %89, %87 : vector<2x256xf32>
    %91 = arith.addf %78, %90 : vector<2x256xf32>
    %c15 = arith.constant 15 : index
    %92 = memref.load %arg2[%c15] : memref<27xf32, #tpu.memory_space<smem>>
    %93 = vector.broadcast %92 : f32 to vector<2x256xf32>
    %94 = arith.mulf %93, %87 : vector<2x256xf32>
    %95 = arith.addf %82, %94 : vector<2x256xf32>
    %c24 = arith.constant 24 : index
    %96 = memref.load %arg2[%c24] : memref<27xf32, #tpu.memory_space<smem>>
    %97 = vector.broadcast %96 : f32 to vector<2x256xf32>
    %98 = arith.mulf %97, %87 : vector<2x256xf32>
    %99 = arith.addf %86, %98 : vector<2x256xf32>
    %100 = vector.extract_strided_slice %2 {offsets = [0, 33], sizes = [2, 256], strides = [1, 1]} : vector<2x290xf32> to vector<2x256xf32>
    %c7 = arith.constant 7 : index
    %101 = memref.load %arg2[%c7] : memref<27xf32, #tpu.memory_space<smem>>
    %102 = vector.broadcast %101 : f32 to vector<2x256xf32>
    %103 = arith.mulf %102, %100 : vector<2x256xf32>
    %104 = arith.addf %91, %103 : vector<2x256xf32>
    %c16 = arith.constant 16 : index
    %105 = memref.load %arg2[%c16] : memref<27xf32, #tpu.memory_space<smem>>
    %106 = vector.broadcast %105 : f32 to vector<2x256xf32>
    %107 = arith.mulf %106, %100 : vector<2x256xf32>
    %108 = arith.addf %95, %107 : vector<2x256xf32>
    %c25 = arith.constant 25 : index
    %109 = memref.load %arg2[%c25] : memref<27xf32, #tpu.memory_space<smem>>
    %110 = vector.broadcast %109 : f32 to vector<2x256xf32>
    %111 = arith.mulf %110, %100 : vector<2x256xf32>
    %112 = arith.addf %99, %111 : vector<2x256xf32>
    %113 = vector.extract_strided_slice %2 {offsets = [0, 34], sizes = [2, 256], strides = [1, 1]} : vector<2x290xf32> to vector<2x256xf32>
    %c8 = arith.constant 8 : index
    %114 = memref.load %arg2[%c8] : memref<27xf32, #tpu.memory_space<smem>>
    %115 = vector.broadcast %114 : f32 to vector<2x256xf32>
    %116 = arith.mulf %115, %113 : vector<2x256xf32>
    %117 = arith.addf %104, %116 : vector<2x256xf32>
    %c17 = arith.constant 17 : index
    %118 = memref.load %arg2[%c17] : memref<27xf32, #tpu.memory_space<smem>>
    %119 = vector.broadcast %118 : f32 to vector<2x256xf32>
    %120 = arith.mulf %119, %113 : vector<2x256xf32>
    %121 = arith.addf %108, %120 : vector<2x256xf32>
    %c26 = arith.constant 26 : index
    %122 = memref.load %arg2[%c26] : memref<27xf32, #tpu.memory_space<smem>>
    %123 = vector.broadcast %122 : f32 to vector<2x256xf32>
    %124 = arith.mulf %123, %113 : vector<2x256xf32>
    %125 = arith.addf %112, %124 : vector<2x256xf32>
    %126 = vector.shape_cast %117 : vector<2x256xf32> to vector<2x1x256xf32>
    %127 = vector.shape_cast %121 : vector<2x256xf32> to vector<2x1x256xf32>
    %128 = vector.shape_cast %125 : vector<2x256xf32> to vector<2x1x256xf32>
    %129 = tpu.concatenate %126, %127, %128 in 1 : vector<2x1x256xf32>, vector<2x1x256xf32>, vector<2x1x256xf32> -> vector<2x3x256xf32>
    %c0_5 = arith.constant 0 : index
    %c0_6 = arith.constant 0 : index
    %c0_7 = arith.constant 0 : index
    %130 = vector.load %arg4[%c0_5, %c0_6, %c0_7] : memref<2x3x256xf32, #tpu.memory_space<vmem>>, vector<2x3x256xf32>
    tpu.vector_store %arg4[%c0_5, %c0_6, %c0_7], %129 {strides = array<i32>} : memref<2x3x256xf32, #tpu.memory_space<vmem>>, vector<2x3x256xf32>,
    return
  }
  func.func @transform_0(%arg0: i32) -> (i32, i32) {
    %c0_i32 = arith.constant 0 : i32
    %c0_i32_0 = arith.constant 0 : i32
    return %arg0, %c0_i32 : i32, i32
  }
  func.func @transform_1(%arg0: i32) -> i32 {
    %c0_i32 = arith.constant 0 : i32
    %c0_i32_0 = arith.constant 0 : i32
    return %c0_i32 : i32
  }
  func.func @transform_2(%arg0: i32) -> i32 {
    %c0_i32 = arith.constant 0 : i32
    %c0_i32_0 = arith.constant 0 : i32
    return %c0_i32 : i32
  }
  func.func @transform_3(%arg0: i32) -> (i32, i32, i32) {
    %c0_i32 = arith.constant 0 : i32
    %c0_i32_0 = arith.constant 0 : i32
    %c0_i32_1 = arith.constant 0 : i32
    return %arg0, %c0_i32, %c0_i32_0 : i32, i32, i32
  }
}

</mosaic_0001>

<bundles_post_ra>
// kernel: tpu_custom_call.1
= control target key start
LH: loop header
LB: loop body
LE: loop exit
PB: predicated region body
PF: predicated region fallthrough
CT: control target
= control target key end

     0   :  { %8 = vsyncpa [#allocation3], 0  ;;  %s1044_s0 = inlined_call_operand.hbm [shape: f32[2,256], index: 0, kind: input, shape index: {}]   ;;  %s1045_s1 = inlined_call_operand.vmem [shape: f32[27], index: 1, kind: input, shape index: {}]   ;;  %s1046_s2 = inlined_call_operand.vmem [shape: f32[3], index: 2, kind: input, shape index: {}]   ;;  %s1047_s3 = inlined_call_operand.vmem [shape: f32[2,3,256], index: 3, kind: output, shape index: {}]  }
   0x1   :  { %9 = vsyncpa [#allocation4], 0  ;;  %s27_s14 = sshll.u32 %s1045_s1, 4  ;;  %s28_s14 = int_to_ptr.vmem [resolvable:$true] %s27_s14 }
   0x2   :  { %10 = vsyncpa [#allocation7], 0  ;;  %s830_s15 = smov [#allocation2]   ;;  %s778_s19 = scalar_lea.hbm %s1044_s0, 64 }
   0x3   :  { %s17_s16 = sshll.u32 %s830_s15, 4  ;;  %p779_p0 = scmp.ne.s32.totalorder %s1044_s0, %s778_s19  ;;  %s18_s16 = int_to_ptr.vmem [resolvable:$true] %s17_s16 }
   0x4   :  { %p782_p1 = scmp.lt.u32.totalorder %s778_s19, %s1044_s0 }
   0x6   :  { %p784_p2 = pnand %p782_p1, %p779_p0 }
   0x8   :  { %787 = shalt.err (!%p784_p2)
}
   0x9   :  { %s788_s1 = scalar_lea.vmem %s18_s16, 64  ;;  %p793_p4 = scmp.lt.s32.totalorder %s18_s16, %s18_s16 }
   0xa   :  { %p789_p3 = scmp.ne.s32.totalorder %s18_s16, %s788_s1  ;;  %p794_p5 = scmp.lt.s32.totalorder %s788_s1, %s788_s1 }
   0xc   :  { %p795_p6 = por %p794_p5, %p793_p4 }
   0xe   :  { %p796_p7 = pnand %p795_p6, %p789_p3 }
  0x10   :  { %799 = shalt.err (!%p796_p7)
}
  0x11   :  { %20 = dma.hbm_to_vmem [thread:$0]  %s1044_s0, 64, %s18_s16, [#allocation3]  }
  0x12   :  { %s800_s26 = scalar_lea.vmem %s28_s14, 16  ;;  %p805_p9 = scmp.lt.s32.totalorder %s28_s14, %s28_s14 }
  0x13   :  { %p801_p8 = scmp.ne.s32.totalorder %s28_s14, %s800_s26  ;;  %p806_p10 = scmp.lt.s32.totalorder %s800_s26, %s800_s26 }
  0x15   :  { %p807_p11 = por %p806_p10, %p805_p9 }
  0x17   :  { %p808_p12 = pnand %p807_p11, %p801_p8 }
  0x19   :  { %811 = shalt.err (!%p808_p12)
}
  0x1a   :  { %s831_s27 = smov [#allocation5]   ;;  %s37_s30 = sshll.u32 %s1046_s2, 4  ;;  %s38_s30 = int_to_ptr.vmem [resolvable:$true] %s37_s30 }
  0x1b   :  { %30 = dma.vmem_to_smem %s28_s14, 16, %s831_s27, [#allocation4]  }
  0x1c   :  { %s812_s4 = scalar_lea.vmem %s38_s30, 16  ;;  %p817_p0 = scmp.lt.s32.totalorder %s38_s30, %s38_s30 }
  0x1d   :  { %p813_p13 = scmp.ne.s32.totalorder %s38_s30, %s812_s4  ;;  %p818_p1 = scmp.lt.s32.totalorder %s812_s4, %s812_s4 }
  0x1f   :  { %p819_p2 = por %p818_p1, %p817_p0 }
  0x21   :  { %p820_p3 = pnand %p819_p2, %p813_p13 }
  0x23   :  { %823 = shalt.err (!%p820_p3)
}
  0x24   :  { %s832_s0 = smov [#allocation6]  }
  0x25   :  { %40 = dma.vmem_to_smem %s38_s30, 16, %s832_s0, [#allocation7]  }
  0x26   :  { %824 = dma.done.wait [#allocation3], 64  }
  0x27   :  { %825 = vsyncadd [#allocation3], 4294967232 }
  0x28   :  { %826 = dma.done.wait [#allocation4], 16  }
  0x29   :  { %827 = vsyncadd [#allocation4], 4294967280 }
  0x2a   :  { %828 = dma.done.wait [#allocation7], 16  }
  0x2b   :  { %829 = vsyncadd [#allocation7], 4294967280 }
  0x2c   :  { %50 = sfence }
  0x2d   :  { %s742_s5 = sld [smem:[#allocation5 + $0x1]]  ;;  %s743_s6 = sld [smem:[#allocation5 + $0xa]]  ;;  %v880_v0 = vld.sshfl [vmem:[#allocation2] sm:$0x33 pattern:$0x76325410] }
  0x2e   :  { %v884_v1 = vcombine.high %v880_v0, %v880_v0  ;;  %s744_s2 = sld [smem:[#allocation5 + $0x13]]  ;;  %s833_s7 = smov 127   ;;  %vm101_vm0 = vcmask 1039360   ;;  %vm162_vm1 = vcmask 1031168   ;;  %vm223_vm2 = vcmask 916480  }
  0x2f   :  { %s745_s8 = sld [smem:[#allocation5 + $0x2]]  ;;  %s746_s9 = sld [smem:[#allocation5 + $0xb]]  ;;  %vm284_vm3 = vcmask 908288   ;;  %vm345_vm4 = vcmask 900096   ;;  %vm406_vm5 = vcmask 785408   ;;  %vm467_vm6 = vcmask 777216  }
  0x30   :  { %s747_s10 = sld [smem:[#allocation5 + $0x14]]  ;;  %s834_s11 = smov 126   ;;  %vm528_vm7 = vcmask 769024   ;;  %vm710_vm8 = vcmask 1040384   ;;  %vm715_vm9 = vcmask 1041408  }
  0x31   :  { %s748_s12 = sld [smem:[#allocation5 + $0x3]]  ;;  %s749_s13 = sld [smem:[#allocation5 + $0xc]] }
  0x32   :  { %s750_s14 = sld [smem:[#allocation5 + $0x15]]  ;;  %s835_s15 = smov 112  }
  0x33   :  { %v88_v2 = vstv %s742_s5  ;;  %v109_v5 = vstv %s743_s6  ;;  %s751_s16 = sld [smem:[#allocation5 + $0x4]]  ;;  %s752_s17 = sld [smem:[#allocation5 + $0xd]] }
  0x34   :  { %v91_v3 = vmul.f32 0.0, %v88_v2  ;;  %v89_v4 = vmul.f32 %v880_v0, %v88_v2  ;;  %v110_v6 = vmul.f32 %v880_v0, %v109_v5  ;;  %v90_v7 = vmul.f32 %v88_v2, %v884_v1  ;;  %s753_s18 = sld [smem:[#allocation5 + $0x16]]  ;;  %s836_s19 = smov 111  }
  0x35   :  { %v112_v8 = vmul.f32 0.0, %v109_v5  ;;  %v111_v9 = vmul.f32 %v109_v5, %v884_v1  ;;  %v129_v10 = vstv %s744_s2  ;;  %v149_v13 = vstv %s745_s8  ;;  %s754_s20 = sld [smem:[#allocation5 + $0x5]]  ;;  %s755_s21 = sld [smem:[#allocation5 + $0xe]] }
  0x36   :  { %99 = vrot.lane.b32.xlu1 %v91_v3, %s833_s7  ;;  %95 = vrot.lane.b32.xlu0 %v89_v4, %s833_s7  ;;  %v131_v11 = vmul.f32 %v129_v10, %v884_v1  ;;  %v130_v12 = vmul.f32 %v880_v0, %v129_v10  ;;  %v150_v14 = vmul.f32 %v880_v0, %v149_v13  ;;  %v132_v15 = vmul.f32 0.0, %v129_v10  ;;  %s756_s22 = sld [smem:[#allocation5 + $0x17]]  ;;  %s837_s23 = smov 110  }
  0x37   :  { %v152_v16 = vmul.f32 0.0, %v149_v13  ;;  %v151_v17 = vmul.f32 %v149_v13, %v884_v1  ;;  %v170_v18 = vstv %s746_s9  ;;  %v190_v21 = vstv %s747_s10  ;;  %s757_s1 = sld [smem:[#allocation5 + $0x6]]  ;;  %s758_s24 = sld [smem:[#allocation5 + $0xf]] }
  0x38   :  { %v172_v19 = vmul.f32 %v170_v18, %v884_v1  ;;  %v171_v20 = vmul.f32 %v880_v0, %v170_v18  ;;  %v191_v22 = vmul.f32 %v880_v0, %v190_v21  ;;  %v173_v23 = vmul.f32 0.0, %v170_v18  ;;  %s759_s25 = sld [smem:[#allocation5 + $0x18]]  ;;  %s838_s26 = smov 96  }
  0x39   :  { %v193_v24 = vmul.f32 0.0, %v190_v21  ;;  %v192_v25 = vmul.f32 %v190_v21, %v884_v1  ;;  %v210_v26 = vstv %s748_s12  ;;  %v231_v29 = vstv %s749_s13  ;;  %s760_s27 = sld [smem:[#allocation5 + $0x7]]  ;;  %s761_s28 = sld [smem:[#allocation5 + $0x10]] }
  0x3a   :  { %116 = vrot.lane.b32.xlu1 %v110_v6, %s833_s7  ;;  %97 = vrot.lane.b32.xlu0 %v90_v7, %s833_s7  ;;  %v212_v27 = vmul.f32 %v210_v26, %v884_v1  ;;  %v211_v28 = vmul.f32 %v880_v0, %v210_v26  ;;  %v232_v30 = vmul.f32 %v880_v0, %v231_v29  ;;  %v213_v31 = vmul.f32 0.0, %v210_v26  ;;  %s69_s29 = sld [smem:[#allocation5]]  ;;  %s762_s30 = sld [smem:[#allocation5 + $0x19]] }
  0x3b   :  { %v234_v32 = vmul.f32 0.0, %v231_v29  ;;  %v233_v33 = vmul.f32 %v231_v29, %v884_v1  ;;  %v251_v34 = vstv %s750_s14  ;;  %v271_v37 = vstv %s751_s16  ;;  %s740_s4 = sld [smem:[#allocation5 + $0x9]]  ;;  %s63_s0 = sld [smem:[#allocation6]] }
  0x3c   :  { %v253_v35 = vmul.f32 %v251_v34, %v884_v1  ;;  %v252_v36 = vmul.f32 %v880_v0, %v251_v34  ;;  %v272_v38 = vmul.f32 %v880_v0, %v271_v37  ;;  %v254_v39 = vmul.f32 0.0, %v251_v34  ;;  %s763_s5 = sld [smem:[#allocation5 + $0x8]]  ;;  %s839_s6 = smov 95  }
  0x3d   :  { %v274_v40 = vmul.f32 0.0, %v271_v37  ;;  %v273_v41 = vmul.f32 %v271_v37, %v884_v1  ;;  %v292_v42 = vstv %s752_s17  ;;  %v312_v45 = vstv %s753_s18  ;;  %s927_s2 = sld [smem:[#allocation6 + $0x1]]  ;;  %s936_s8 = sld [smem:[#allocation6 + $0x2]] }
  0x3e   :  { %120 = vrot.lane.b32.xlu1 %v112_v8, %s833_s7  ;;  %118 = vrot.lane.b32.xlu0 %v111_v9, %s833_s7  ;;  %v294_v43 = vmul.f32 %v292_v42, %v884_v1  ;;  %v293_v44 = vmul.f32 %v880_v0, %v292_v42  ;;  %v313_v46 = vmul.f32 %v880_v0, %v312_v45  ;;  %v295_v47 = vmul.f32 0.0, %v292_v42  ;;  %s764_s9 = sld [smem:[#allocation5 + $0x11]]  ;;  %s765_s10 = sld [smem:[#allocation5 + $0x1a]] }
  0x3f   :  { %v315_v48 = vmul.f32 0.0, %v312_v45  ;;  %v314_v49 = vmul.f32 %v312_v45, %v884_v1  ;;  %v332_v50 = vstv %s754_s20  ;;  %v353_v53 = vstv %s755_s21 }
  0x40   :  { %v334_v51 = vmul.f32 %v332_v50, %v884_v1  ;;  %v333_v52 = vmul.f32 %v880_v0, %v332_v50  ;;  %v354_v54 = vmul.f32 %v880_v0, %v353_v53  ;;  %v335_v55 = vmul.f32 0.0, %v332_v50 }
  0x41   :  { %v356_v56 = vmul.f32 0.0, %v353_v53  ;;  %v355_v57 = vmul.f32 %v353_v53, %v884_v1  ;;  %v373_v58 = vstv %s756_s22  ;;  %v393_v61 = vstv %s757_s1 }
  0x42   :  { %138 = vrot.lane.b32.xlu1 %v131_v11, %s833_s7  ;;  %136 = vrot.lane.b32.xlu0 %v130_v12, %s833_s7  ;;  %v375_v59 = vmul.f32 %v373_v58, %v884_v1  ;;  %v374_v60 = vmul.f32 %v880_v0, %v373_v58  ;;  %v394_v62 = vmul.f32 %v880_v0, %v393_v61  ;;  %v376_v63 = vmul.f32 0.0, %v373_v58 }
  0x43   :  { %v396_v2 = vmul.f32 0.0, %v393_v61  ;;  %v395_v3 = vmul.f32 %v393_v61, %v884_v1  ;;  %v414_v4 = vstv %s758_s24  ;;  %v434_v7 = vstv %s759_s25 }
  0x44   :  { %v416_v5 = vmul.f32 %v414_v4, %v884_v1  ;;  %v415_v6 = vmul.f32 %v880_v0, %v414_v4  ;;  %v435_v8 = vmul.f32 %v880_v0, %v434_v7  ;;  %v417_v9 = vmul.f32 0.0, %v414_v4 }
  0x45   :  { %v437_v10 = vmul.f32 0.0, %v434_v7  ;;  %v436_v11 = vmul.f32 %v434_v7, %v884_v1  ;;  %v454_v12 = vstv %s760_s27  ;;  %v70_v18 = vstv %s69_s29 }
  0x46   :  { %156 = vrot.lane.b32.xlu1 %v150_v14, %s834_s11  ;;  %140 = vrot.lane.b32.xlu0 %v132_v15, %s833_s7  ;;  %v456_v13 = vmul.f32 %v454_v12, %v884_v1  ;;  %v455_v14 = vmul.f32 %v880_v0, %v454_v12  ;;  %v475_v15 = vstv %s761_s28  ;;  %s929_s7 = sld [smem:[#allocation5 + $0x12]]  ;;  %v71_v21 = vmul.f32 %v880_v0, %v70_v18 }
  0x4a   :  { %160 = vrot.lane.b32.xlu1 %v152_v16, %s834_s11  ;;  %158 = vrot.lane.b32.xlu0 %v151_v17, %s834_s11  ;;  %v476_v16 = vmul.f32 %v880_v0, %v475_v15  ;;  %v457_v17 = vmul.f32 0.0, %v454_v12 }
  0x4e   :  { %179 = vrot.lane.b32.xlu1 %v172_v19, %s834_s11  ;;  %177 = vrot.lane.b32.xlu0 %v171_v20, %s834_s11  ;;  %v478_v19 = vmul.f32 0.0, %v475_v15  ;;  %v477_v20 = vmul.f32 %v475_v15, %v884_v1 }
  0x52   :  { %197 = vrot.lane.b32.xlu1 %v191_v22, %s834_s11  ;;  %181 = vrot.lane.b32.xlu0 %v173_v23, %s834_s11  ;;  %v72_v22 = vmul.f32 %v70_v18, %v884_v1  ;;  %v495_v23 = vstv %s762_s30 }
  0x53   :  { %v496_v34 = vmul.f32 %v880_v0, %v495_v23 }
  0x56   :  { %201 = vrot.lane.b32.xlu1 %v193_v24, %s834_s11  ;;  %199 = vrot.lane.b32.xlu0 %v192_v25, %s834_s11  ;;  %v76_v24 = vstv %s740_s4  ;;  %v64_v25 = vstv %s63_s0  ;;  %s840_s11 = smov 94  }
  0x57   :  { %v77_v29 = vmul.f32 %v880_v0, %v76_v24 }
  0x5a   :  { %219 = vrot.lane.b32.xlu1 %v212_v27, %s835_s15  ;;  %217 = vrot.lane.b32.xlu0 %v211_v28, %s835_s15  ;;  %v497_v28 = vmul.f32 %v495_v23, %v884_v1 }
  0x5e   :  { %238 = vrot.lane.b32.xlu1 %v232_v30, %s835_s15  ;;  %221 = vrot.lane.b32.xlu0 %v213_v31, %s835_s15  ;;  %v78_v30 = vmul.f32 %v76_v24, %v884_v1  ;;  %v515_v31 = vstv %s763_s5 }
  0x62   :  { %242 = vrot.lane.b32.xlu1 %v234_v32, %s835_s15  ;;  %240 = vrot.lane.b32.xlu0 %v233_v33, %s835_s15  ;;  %v73_v32 = vadd.f32 %v71_v21, %v64_v25  ;;  %v74_v33 = vadd.f32 %v72_v22, %v64_v25 }
  0x66   :  { %260 = vrot.lane.b32.xlu1 %v253_v35, %s835_s15  ;;  %258 = vrot.lane.b32.xlu0 %v252_v36, %s835_s15  ;;  %v66_v35 = vstv %s927_s2  ;;  %v82_v36 = vstv %s929_s7 }
  0x67   :  { %v79_v42 = vadd.f32 %v77_v29, %v66_v35 }
  0x6a   :  { %278 = vrot.lane.b32.xlu1 %v272_v38, %s836_s19  ;;  %262 = vrot.lane.b32.xlu0 %v254_v39, %s835_s15  ;;  %v516_v39 = vmul.f32 %v880_v0, %v515_v31 }
  0x6e   :  { %282 = vrot.lane.b32.xlu1 %v274_v40, %s836_s19  ;;  %280 = vrot.lane.b32.xlu0 %v273_v41, %s836_s19 }
  0x72   :  { %301 = vrot.lane.b32.xlu1 %v294_v43, %s836_s19  ;;  %299 = vrot.lane.b32.xlu0 %v293_v44, %s836_s19  ;;  %v80_v43 = vadd.f32 %v78_v30, %v66_v35 }
  0x76   :  { %319 = vrot.lane.b32.xlu1 %v313_v46, %s836_s19  ;;  %303 = vrot.lane.b32.xlu0 %v295_v47, %s836_s19  ;;  %v498_v46 = vmul.f32 0.0, %v495_v23  ;;  %v83_v47 = vmul.f32 %v880_v0, %v82_v36 }
  0x7a   :  { %323 = vrot.lane.b32.xlu1 %v315_v48, %s836_s19  ;;  %321 = vrot.lane.b32.xlu0 %v314_v49, %s836_s19  ;;  %v68_v48 = vstv %s936_s8 }
  0x7b   :  { %v85_v58 = vadd.f32 %v83_v47, %v68_v48 }
  0x7e   :  { %341 = vrot.lane.b32.xlu1 %v334_v51, %s837_s23  ;;  %339 = vrot.lane.b32.xlu0 %v333_v52, %s837_s23  ;;  %v518_v51 = vmul.f32 0.0, %v515_v31 }
  0x82   :  { %360 = vrot.lane.b32.xlu1 %v354_v54, %s837_s23  ;;  %343 = vrot.lane.b32.xlu0 %v335_v55, %s837_s23  ;;  %v517_v54 = vmul.f32 %v515_v31, %v884_v1  ;;  %v84_v55 = vmul.f32 %v82_v36, %v884_v1 }
  0x86   :  { %364 = vrot.lane.b32.xlu1 %v356_v56, %s837_s23  ;;  %362 = vrot.lane.b32.xlu0 %v355_v57, %s837_s23 }
  0x8a   :  { %382 = vrot.lane.b32.xlu1 %v375_v59, %s837_s23  ;;  %380 = vrot.lane.b32.xlu0 %v374_v60, %s837_s23  ;;  %v536_v59 = vstv %s764_s9 }
  0x8b   :  { %v537_v4 = vmul.f32 %v880_v0, %v536_v59 }
  0x8e   :  { %400 = vrot.lane.b32.xlu1 %v394_v62, %s838_s26  ;;  %384 = vrot.lane.b32.xlu0 %v376_v63, %s837_s23  ;;  %v538_v63 = vmul.f32 %v536_v59, %v884_v1 }
  0x92   :  { %404 = vrot.lane.b32.xlu1 %v396_v2, %s838_s26  ;;  %402 = vrot.lane.b32.xlu0 %v395_v3, %s838_s26  ;;  %v86_v3 = vadd.f32 %v84_v55, %v68_v48 }
  0x96   :  { %423 = vrot.lane.b32.xlu1 %v416_v5, %s838_s26  ;;  %421 = vrot.lane.b32.xlu0 %v415_v6, %s838_s26  ;;  %v556_v5 = vstv %s765_s10 }
  0x97   :  { %v559_v18 = vmul.f32 0.0, %v556_v5 }
  0x9a   :  { %441 = vrot.lane.b32.xlu1 %v435_v8, %s838_s26  ;;  %425 = vrot.lane.b32.xlu0 %v417_v9, %s838_s26 }
  0x9e   :  { %445 = vrot.lane.b32.xlu1 %v437_v10, %s838_s26  ;;  %443 = vrot.lane.b32.xlu0 %v436_v11, %s838_s26  ;;  %v557_v10 = vmul.f32 %v880_v0, %v556_v5  ;;  %v539_v11 = vmul.f32 0.0, %v536_v59 }
  0xa2   :  { %463 = vrot.lane.b32.xlu1 %v456_v13, %s839_s6  ;;  %461 = vrot.lane.b32.xlu0 %v455_v14, %s839_s6 }
  0xa6   :  { %482 = vrot.lane.b32.xlu1 %v476_v16, %s839_s6  ;;  %465 = vrot.lane.b32.xlu0 %v457_v17, %s839_s6 }
  0xa8   :  { %v100_v26 = vpop.permute.xlu1 %99  ;;  %v96_v27 = vpop.permute.xlu0 %95 }
  0xaa   :  { %486 = vrot.lane.b32.xlu1 %v478_v19, %s839_s6  ;;  %484 = vrot.lane.b32.xlu0 %v477_v20, %s839_s6  ;;  %v558_v19 = vmul.f32 %v556_v5, %v884_v1 }
  0xac   :  { %v117_v37 = vpop.permute.xlu1 %116  ;;  %v98_v38 = vpop.permute.xlu0 %97 }
  0xad   :  { %v102_v40 = vsel %vm101_vm0, %v96_v27, %v98_v38  ;;  %v103_v41 = vsel %vm101_vm0, %v98_v38, %v100_v26 }
  0xae   :  { %v106_v44 = vadd.f32 %v102_v40, %v73_v32  ;;  %v107_v45 = vadd.f32 %v103_v41, %v74_v33  ;;  %504 = vrot.lane.b32.xlu1 %v497_v28, %s839_s6  ;;  %502 = vrot.lane.b32.xlu0 %v496_v34, %s839_s6 }
  0xb0   :  { %v121_v49 = vpop.permute.xlu1 %120  ;;  %v119_v50 = vpop.permute.xlu0 %118 }
  0xb1   :  { %v122_v52 = vsel %vm101_vm0, %v117_v37, %v119_v50  ;;  %v123_v53 = vsel %vm101_vm0, %v119_v50, %v121_v49 }
  0xb2   :  { %v126_v56 = vadd.f32 %v122_v52, %v79_v42  ;;  %v127_v57 = vadd.f32 %v123_v53, %v80_v43  ;;  %522 = vrot.lane.b32.xlu1 %v516_v39, %s840_s11  ;;  %506 = vrot.lane.b32.xlu0 %v498_v46, %s839_s6 }
  0xb4   :  { %v139_v60 = vpop.permute.xlu1 %138  ;;  %v137_v61 = vpop.permute.xlu0 %136 }
  0xb5   :  { %v142_v62 = vsel %vm101_vm0, %v137_v61, %v139_v60 }
  0xb6   :  { %v146_v2 = vadd.f32 %v142_v62, %v85_v58  ;;  %526 = vrot.lane.b32.xlu1 %v518_v51, %s840_s11  ;;  %524 = vrot.lane.b32.xlu0 %v517_v54, %s840_s11 }
  0xb8   :  { %v157_v6 = vpop.permute.xlu1 %156  ;;  %v141_v7 = vpop.permute.xlu0 %140 }
  0xb9   :  { %v143_v8 = vsel %vm101_vm0, %v139_v60, %v141_v7 }
  0xba   :  { %v147_v9 = vadd.f32 %v143_v8, %v86_v3  ;;  %545 = vrot.lane.b32.xlu1 %v538_v63, %s840_s11  ;;  %543 = vrot.lane.b32.xlu0 %v537_v4, %s840_s11 }
  0xbc   :  { %v161_v12 = vpop.permute.xlu1 %160  ;;  %v159_v13 = vpop.permute.xlu0 %158 }
  0xbd   :  { %v163_v14 = vsel %vm162_vm1, %v157_v6, %v159_v13  ;;  %v164_v15 = vsel %vm162_vm1, %v159_v13, %v161_v12 }
  0xbe   :  { %v167_v16 = vadd.f32 %v163_v14, %v106_v44  ;;  %v168_v17 = vadd.f32 %v164_v15, %v107_v45  ;;  %563 = vrot.lane.b32.xlu1 %v557_v10, %s840_s11  ;;  %547 = vrot.lane.b32.xlu0 %v539_v11, %s840_s11 }
  0xc0   :  { %v180_v20 = vpop.permute.xlu1 %179  ;;  %v178_v21 = vpop.permute.xlu0 %177 }
  0xc1   :  { %v183_v0 = vsel %vm162_vm1, %v178_v21, %v180_v20 }
  0xc2   :  { %v187_v22 = vadd.f32 %v183_v0, %v126_v56  ;;  %567 = vrot.lane.b32.xlu1 %v559_v18, %s840_s11  ;;  %565 = vrot.lane.b32.xlu0 %v558_v19, %s840_s11 }
  0xc4   :  { %v198_v23 = vpop.permute.xlu1 %197  ;;  %v182_v24 = vpop.permute.xlu0 %181 }
  0xc5   :  { %v184_v25 = vsel %vm162_vm1, %v180_v20, %v182_v24 }
  0xc6   :  { %v188_v26 = vadd.f32 %v184_v25, %v127_v57 }
  0xc8   :  { %v202_v27 = vpop.permute.xlu1 %201  ;;  %v200_v28 = vpop.permute.xlu0 %199 }
  0xc9   :  { %v203_v29 = vsel %vm162_vm1, %v198_v23, %v200_v28  ;;  %v204_v1 = vsel %vm162_vm1, %v200_v28, %v202_v27 }
  0xca   :  { %v207_v30 = vadd.f32 %v203_v29, %v146_v2  ;;  %v208_v31 = vadd.f32 %v204_v1, %v147_v9 }
  0xcc   :  { %v220_v32 = vpop.permute.xlu1 %219  ;;  %v218_v33 = vpop.permute.xlu0 %217 }
  0xcd   :  { %v224_v34 = vsel %vm223_vm2, %v218_v33, %v220_v32 }
  0xce   :  { %v228_v35 = vadd.f32 %v224_v34, %v167_v16 }
  0xd0   :  { %v239_v36 = vpop.permute.xlu1 %238  ;;  %v222_v37 = vpop.permute.xlu0 %221 }
  0xd1   :  { %v225_v38 = vsel %vm223_vm2, %v220_v32, %v222_v37 }
  0xd2   :  { %v229_v39 = vadd.f32 %v225_v38, %v168_v17 }
  0xd4   :  { %v243_v40 = vpop.permute.xlu1 %242  ;;  %v241_v41 = vpop.permute.xlu0 %240 }
  0xd5   :  { %v244_v42 = vsel %vm223_vm2, %v239_v36, %v241_v41  ;;  %v245_v43 = vsel %vm223_vm2, %v241_v41, %v243_v40  ;;  %v841_v40 = vmov 1966171168  }
  0xd6   :  { %v248_v44 = vadd.f32 %v244_v42, %v187_v22  ;;  %v249_v45 = vadd.f32 %v245_v43, %v188_v26  ;;  %v579_v41 = vunpack.c.l.s4 %v841_v40  ;;  %v581_v42 = vlaneseq }
  0xd8   :  { %v261_v46 = vpop.permute.xlu1 %260  ;;  %v259_v47 = vpop.permute.xlu0 %258 }
  0xd9   :  { %v264_v48 = vsel %vm223_vm2, %v259_v47, %v261_v46 }
  0xda   :  { %v268_v49 = vadd.f32 %v264_v48, %v207_v30 }
  0xdc   :  { %v279_v50 = vpop.permute.xlu1 %278  ;;  %v263_v51 = vpop.permute.xlu0 %262 }
  0xdd   :  { %v265_v52 = vsel %vm223_vm2, %v261_v46, %v263_v51  ;;  %v580_v51 = vunpack.c.0.s8 %v579_v41 }
  0xde   :  { %v269_v53 = vadd.f32 %v265_v52, %v208_v31  ;;  %v582_v52 = vshrl.u32 %v581_v42, 7 }
  0xe0   :  { %v283_v54 = vpop.permute.xlu1 %282  ;;  %v281_v55 = vpop.permute.xlu0 %280 }
  0xe1   :  { %v285_v56 = vsel %vm284_vm3, %v279_v50, %v281_v55  ;;  %v286_v57 = vsel %vm284_vm3, %v281_v55, %v283_v54 }
  0xe2   :  { %v289_v58 = vadd.f32 %v285_v56, %v228_v35  ;;  %v290_v59 = vadd.f32 %v286_v57, %v229_v39 }
  0xe4   :  { %v302_v60 = vpop.permute.xlu1 %301  ;;  %v300_v61 = vpop.permute.xlu0 %299 }
  0xe5   :  { %v305_v62 = vsel %vm284_vm3, %v300_v61, %v302_v60 }
  0xe6   :  { %v988_v63 = vadd.f32 %v305_v62, %v248_v44 }
  0xe8   :  { %v320_v2 = vpop.permute.xlu1 %319  ;;  %v304_v3 = vpop.permute.xlu0 %303 }
  0xe9   :  { %v306_v4 = vsel %vm284_vm3, %v302_v60, %v304_v3 }
  0xea   :  { %v991_v5 = vadd.f32 %v306_v4, %v249_v45  ;;  %v1011_v4 = vsub.s32 %v580_v51, %v582_v52 }
  0xec   :  { %v324_v6 = vpop.permute.xlu1 %323  ;;  %v322_v7 = vpop.permute.xlu0 %321 }
  0xed   :  { %v325_v8 = vsel %vm284_vm3, %v320_v2, %v322_v7  ;;  %v326_v9 = vsel %vm284_vm3, %v322_v7, %v324_v6 }
  0xee   :  { %v995_v10 = vadd.f32 %v325_v8, %v268_v49  ;;  %v997_v11 = vadd.f32 %v326_v9, %v269_v53 }
  0xf0   :  { %v342_v12 = vpop.permute.xlu1 %341  ;;  %v340_v13 = vpop.permute.xlu0 %339 }
  0xf1   :  { %v346_v36 = vsel %vm345_vm4, %v340_v13, %v342_v12 }
  0xf2   :  { %v350_v43 = vadd.f32 %v346_v36, %v289_v58 }
  0xf4   :  { %v361_v14 = vpop.permute.xlu1 %360  ;;  %v344_v15 = vpop.permute.xlu0 %343 }
  0xf5   :  { %v347_v37 = vsel %vm345_vm4, %v342_v12, %v344_v15 }
  0xf6   :  { %v351_v44 = vadd.f32 %v347_v37, %v290_v59 }
  0xf8   :  { %v365_v16 = vpop.permute.xlu1 %364  ;;  %v363_v17 = vpop.permute.xlu0 %362 }
  0xf9   :  { %v366_v57 = vsel %vm345_vm4, %v361_v14, %v363_v17  ;;  %v367_v58 = vsel %vm345_vm4, %v363_v17, %v365_v16 }
  0xfa   :  { %v370_v6 = vadd.f32 %v366_v57, %v988_v63  ;;  %v371_v7 = vadd.f32 %v367_v58, %v991_v5 }
  0xfc   :  { %v383_v18 = vpop.permute.xlu1 %382  ;;  %v381_v19 = vpop.permute.xlu0 %380 }
  0xfd   :  { %v386_v13 = vsel %vm345_vm4, %v381_v19, %v383_v18 }
 0x100   :  { %v401_v20 = vpop.permute.xlu1 %400  ;;  %v385_v21 = vpop.permute.xlu0 %384 }
 0x101   :  { %v387_v14 = vsel %vm345_vm4, %v383_v18, %v385_v21 }
 0x102   :  { %v391_v19 = vadd.f32 %v387_v14, %v997_v11 }
 0x104   :  { %v405_v0 = vpop.permute.xlu1 %404  ;;  %v403_v22 = vpop.permute.xlu0 %402 }
 0x105   :  { %v407_v38 = vsel %vm406_vm5, %v401_v20, %v403_v22  ;;  %v408_v39 = vsel %vm406_vm5, %v403_v22, %v405_v0 }
 0x106   :  { %v411_v49 = vadd.f32 %v407_v38, %v350_v43  ;;  %v412_v50 = vadd.f32 %v408_v39, %v351_v44  ;;  %v656_v39 = vsub.s32 1, %v582_v52 }
 0x108   :  { %v424_v23 = vpop.permute.xlu1 %423  ;;  %v422_v24 = vpop.permute.xlu0 %421 }
 0x109   :  { %v427_v2 = vsel %vm406_vm5, %v422_v24, %v424_v23 }
 0x10a   :  { %v431_v17 = vadd.f32 %v427_v2, %v370_v6 }
 0x10c   :  { %v442_v25 = vpop.permute.xlu1 %441  ;;  %v426_v26 = vpop.permute.xlu0 %425 }
 0x10d   :  { %v428_v3 = vsel %vm406_vm5, %v424_v23, %v426_v26  ;;  %v390_v23 = vadd.f32 %v386_v13, %v995_v10  ;;  %v652_v10 = vsub.s32 0, %v582_v52 }
 0x10e   :  { %v432_v20 = vadd.f32 %v428_v3, %v371_v7 }
 0x110   :  { %v446_v27 = vpop.permute.xlu1 %445  ;;  %v444_v28 = vpop.permute.xlu0 %443 }
 0x111   :  { %v447_v0 = vsel %vm406_vm5, %v442_v25, %v444_v28  ;;  %v448_v22 = vsel %vm406_vm5, %v444_v28, %v446_v27 }
 0x112   :  { %v452_v27 = vadd.f32 %v448_v22, %v391_v19 }
 0x114   :  { %v464_v29 = vpop.permute.xlu1 %463  ;;  %v462_v1 = vpop.permute.xlu0 %461 }
 0x115   :  { %v468_v47 = vsel %vm467_vm6, %v462_v1, %v464_v29 }
 0x116   :  { %v472_v53 = vadd.f32 %v468_v47, %v411_v49 }
 0x118   :  { %v483_v30 = vpop.permute.xlu1 %482  ;;  %v466_v31 = vpop.permute.xlu0 %465 }
 0x119   :  { %v469_v48 = vsel %vm467_vm6, %v464_v29, %v466_v31 }
 0x11a   :  { %v473_v54 = vadd.f32 %v469_v48, %v412_v50 }
 0x11c   :  { %v487_v32 = vpop.permute.xlu1 %486  ;;  %v485_v33 = vpop.permute.xlu0 %484 }
 0x11d   :  { %v488_v15 = vsel %vm467_vm6, %v483_v30, %v485_v33  ;;  %v489_v16 = vsel %vm467_vm6, %v485_v33, %v487_v32  ;;  %v451_v30 = vadd.f32 %v447_v0, %v390_v23 }
 0x11e   :  { %v492_v24 = vadd.f32 %v488_v15, %v431_v17  ;;  %v493_v18 = vadd.f32 %v489_v16, %v432_v20 }
 0x120   :  { %v505_v34 = vpop.permute.xlu1 %504  ;;  %v503_v35 = vpop.permute.xlu0 %502 }
 0x121   :  { %v508_v29 = vsel %vm467_vm6, %v503_v35, %v505_v34 }
 0x122   :  { %v512_v33 = vadd.f32 %v508_v29, %v451_v30 }
 0x124   :  { %v523_v45 = vpop.permute.xlu1 %522  ;;  %v507_v46 = vpop.permute.xlu0 %506 }
 0x125   :  { %v509_v1 = vsel %vm467_vm6, %v505_v34, %v507_v46 }
 0x126   :  { %v513_v36 = vadd.f32 %v509_v1, %v452_v27 }
 0x128   :  { %v527_v55 = vpop.permute.xlu1 %526  ;;  %v525_v56 = vpop.permute.xlu0 %524 }
 0x129   :  { %v529_v59 = vsel %vm528_vm7, %v523_v45, %v525_v56  ;;  %v530_v60 = vsel %vm528_vm7, %v525_v56, %v527_v55 }
 0x12a   :  { %v533_v61 = vadd.f32 %v529_v59, %v472_v53  ;;  %v534_v62 = vadd.f32 %v530_v60, %v473_v54 }
 0x12c   :  { %v577_v8 = vcombine.low %v533_v61, %v534_v62  ;;  %v546_v9 = vpop.permute.xlu1 %545  ;;  %v544_v12 = vpop.permute.xlu0 %543 }
 0x12d   :  { %v549_v5 = vsel %vm528_vm7, %v544_v12, %v546_v9 }
 0x12e   :  { %v584_v63 = vrot.slane %v577_v8, %v1011_v4  ;;  %v553_v28 = vadd.f32 %v549_v5, %v492_v24 }
 0x130   :  { %v564_v21 = vpop.permute.xlu1 %563  ;;  %v548_v26 = vpop.permute.xlu0 %547  ;;  %v585_v32 = vcombine.high %v584_v63, %v584_v63  ;;  %v592_v40 = vrot.slane %v584_v63, %v1011_v4 }
 0x131   :  { %v550_v25 = vsel %vm528_vm7, %v546_v9, %v548_v26 }
 0x132   :  { %v554_v31 = vadd.f32 %v550_v25, %v493_v18  ;;  %v599_v44 = vrot.slane %v585_v32, %v1011_v4  ;;  %v653_v48 = vrot.slane %v592_v40, %v652_v10  ;;  %v657_v49 = vrot.slane %v592_v40, %v656_v39 }
 0x134   :  { %v602_v37 = vcombine.low %v553_v28, %v554_v31  ;;  %v568_v11 = vpop.permute.xlu1 %567  ;;  %v566_v38 = vpop.permute.xlu0 %565  ;;  %v661_v54 = vrot.slane %v599_v44, %v652_v10  ;;  %v665_v55 = vrot.slane %v599_v44, %v656_v39 }
 0x135   :  { %v569_v35 = vsel %vm528_vm7, %v564_v21, %v566_v38  ;;  %v570_v34 = vsel %vm528_vm7, %v566_v38, %v568_v11 }
 0x136   :  { %v609_v41 = vrot.slane %v602_v37, %v1011_v4  ;;  %v573_v42 = vadd.f32 %v569_v35, %v512_v33  ;;  %v574_v43 = vadd.f32 %v570_v34, %v513_v36 }
 0x138   :  { %v610_v45 = vcombine.high %v609_v41, %v609_v41  ;;  %v617_v46 = vrot.slane %v609_v41, %v1011_v4  ;;  %v627_v47 = vcombine.low %v573_v42, %v574_v43 }
 0x13a   :  { %v624_v50 = vrot.slane %v610_v45, %v1011_v4  ;;  %v673_v51 = vrot.slane %v617_v46, %v652_v10  ;;  %v677_v52 = vrot.slane %v617_v46, %v656_v39  ;;  %v634_v53 = vrot.slane %v627_v47, %v1011_v4 }
 0x13c   :  { %v681_v56 = vrot.slane %v624_v50, %v652_v10  ;;  %v685_v57 = vrot.slane %v624_v50, %v656_v39  ;;  %v711_v58 = vsel %vm710_vm8, %v653_v48, %v673_v51  ;;  %v712_v59 = vsel %vm710_vm8, %v657_v49, %v677_v52 }
 0x13d   :  { %v635_v60 = vcombine.high %v634_v53, %v634_v53  ;;  %v642_v61 = vrot.slane %v634_v53, %v1011_v4 }
 0x13e   :  { %v713_v62 = vsel %vm710_vm8, %v661_v54, %v681_v56  ;;  %v714_v2 = vsel %vm710_vm8, %v665_v55, %v685_v57 }
 0x13f   :  { %v649_v3 = vrot.slane %v635_v60, %v1011_v4  ;;  %v693_v6 = vrot.slane %v642_v61, %v652_v10  ;;  %v697_v7 = vrot.slane %v642_v61, %v656_v39 }
 0x141   :  { %v701_v8 = vrot.slane %v649_v3, %v652_v10  ;;  %v705_v9 = vrot.slane %v649_v3, %v656_v39  ;;  %v716_v12 = vsel %vm715_vm9, %v711_v58, %v693_v6  ;;  %v717_v13 = vsel %vm715_vm9, %v712_v59, %v697_v7 }
 0x142   :  { %v724_v14 = vcombine.low %v716_v12, %v717_v13 }
 0x143   :  { %v718_v15 = vsel %vm715_vm9, %v713_v62, %v701_v8  ;;  %v719_v16 = vsel %vm715_vm9, %v714_v2, %v705_v9 }
 0x144   :  { %v725_v17 = vcombine.low %v718_v15, %v719_v16  ;;  %728 = vst [vmem:[%s1047_s3] sm:$0x77] %v724_v14 }
 0x146   :  { %729 = vst [vmem:[%s1047_s3 + $0x8] sm:$0x77] %v725_v17 }
 0x147   :  { %734 = vsyncpa [#allocation3], 1 }
 0x148   :  { %735 = vsyncpa [#allocation4], 1 }
 0x149   :  { %736 = vsyncpa [#allocation7], 1 }

</bundles_post_ra>
